<compile_context>
chip_gen: v5e
topology: v5e:2x2
jax: 0.10.0
libtpu: 0.0.40
codegen_flags: <defaults>
</compile_context>

<pallas_src>
import math

import jax
import jax.numpy as jnp
from jax.experimental import pallas as pl
from jax.experimental.pallas import tpu as pltpu

LANE = 128      # lane width / MXU N tile
SUBLANE = 8     # f32 sublane count


def _round_up(x, m):
    return ((x + m - 1) // m) * m


def _softplus(x):
    # Numerically stable softplus == torch.nn.Softplus() semantics (f32 math).
    return jnp.maximum(x, 0.0) + jnp.log1p(jnp.exp(-jnp.abs(x)))


def make_mlp_kernel(n_linear, compute_dtype):
    """Kernel refs: (x, w0, b0, w1, b1, ..., w_{n-1}, b_{n-1}, out)."""
    def kernel(*refs):
        x_ref = refs[0]
        o_ref = refs[-1]
        h = x_ref[...].astype(compute_dtype)     # no-op: wrapper feeds compute_dtype
        for i in range(n_linear):
            w = refs[1 + 2 * i][...]              # (in_pad, out_pad), compute_dtype
            b = refs[2 + 2 * i][...]              # (1, out_pad), float32
            acc = jnp.dot(h, w, preferred_element_type=jnp.float32) + b
            if i < n_linear - 1:
                h = _softplus(acc).astype(compute_dtype)   # activation in f32
            else:
                h = acc
        o_ref[...] = h.astype(o_ref.dtype)
    return kernel


def init_mlp_params(key, shape, num_layers=3, num_units=16, dtype=jnp.float32):
    """Mirrors nn.Linear default init U(-1/sqrt(in), 1/sqrt(in)).

    Returns list of (W, b): W is (in_features, out_features), b is (1, out)."""
    c, h, w = shape
    d = c * h * w
    dims = [d, num_units] + [num_units] * (num_layers - 2) + [d]
    params = []
    for i in range(len(dims) - 1):
        fan_in, fan_out = dims[i], dims[i + 1]
        key, kw, kb = jax.random.split(key, 3)
        bound = 1.0 / math.sqrt(fan_in)
        W = jax.random.uniform(kw, (fan_in, fan_out), dtype, -bound, bound)
        b = jax.random.uniform(kb, (1, fan_out), dtype, -bound, bound)
        params.append((W, b))
    return params


def _pad_and_cast_params(params, compute_dtype):
    """Zero-pad every layer to lane-multiple widths; weights in compute_dtype.

    Zero weight rows/cols + zero bias lanes guarantee padded lanes never feed
    real outputs (padding invariant relied on by the kernel)."""
    padded = []
    for W, b in params:
        fi, fo = W.shape
        fi_p, fo_p = _round_up(fi, LANE), _round_up(fo, LANE)
        Wp = jnp.zeros((fi_p, fo_p), compute_dtype).at[:fi, :fo].set(
            W.astype(compute_dtype))
        bp = jnp.zeros((1, fo_p), jnp.float32).at[:, :fo].set(
            b.astype(jnp.float32))
        padded.append((Wp, bp))
    return padded


def _choose_tm(B, max_tm=512):
    """Batch tile selection.

    * Small batches (<=128): one grid step with block == full batch dim
      (allowed even when not a sublane multiple; no padding copy).
    * Large batches: prefer the largest tile in {512,256,128,64} that divides
      B exactly AND yields >= 4 grid steps (so each v7x TC pipelines >= 2
      steps); otherwise the largest exact divisor; otherwise 128 with a
      padded final tile (ragged fallback).
    """
    if B <= 128:
        return B
    for tm in (512, 256, 128, 64):
        if tm <= max_tm and B % tm == 0 and B // tm >= 4:
            return tm
    for tm in (512, 256, 128, 64, 32, 16, 8):
        if tm <= max_tm and B % tm == 0:
            return tm
    return 128


def mlp_forward(x, params, shape, *, compute_dtype=jnp.bfloat16,
                out_dtype=jnp.float32):
    """x: (B, C, H, W).  Returns (B, C, H, W) in out_dtype (default f32)."""
    c, h, w = shape
    B = x.shape[0]
    d = c * h * w
    d_pad = _round_up(d, LANE)

    padded = _pad_and_cast_params(params, compute_dtype)
    n_linear = len(padded)
    out_pad = padded[-1][0].shape[1]          # == d_pad

    tm = _choose_tm(B)
    B_pad = _round_up(B, tm)

    # nn.Flatten(); cast to compute dtype so the input DMA is bf16 on the fast
    # path.  Only materialize a padded copy when strictly necessary.
    x_flat = x.reshape(B, d).astype(compute_dtype)
    if B_pad != B or d_pad != d:
        x_in = jnp.zeros((B_pad, d_pad), compute_dtype).at[:B, :d].set(x_flat)
    else:
        x_in = x_flat

    flat_args = [x_in]
    for Wp, bp in padded:
        flat_args.extend([Wp, bp])

    in_specs = [pl.BlockSpec((tm, d_pad), lambda i: (i, 0))]
    weight_bytes = 0
    for Wp, bp in padded:
        # Constant index_map -> weights/biases stay resident in VMEM across
        # the batch grid (DMA'd once, no re-fetch between grid steps).
        in_specs.append(pl.BlockSpec(Wp.shape, lambda i: (0, 0)))
        in_specs.append(pl.BlockSpec(bp.shape, lambda i: (0, 0)))
        weight_bytes += Wp.size * Wp.dtype.itemsize + bp.size * 4
    out_specs = pl.BlockSpec((tm, out_pad), lambda i: (i, 0))

    in_itemsize = jnp.dtype(compute_dtype).itemsize
    out_itemsize = jnp.dtype(out_dtype).itemsize
    flops = 2 * B_pad * sum(Wp.shape[0] * Wp.shape[1] for Wp, _ in padded)
    transcendentals = B_pad * sum(Wp.shape[1] for Wp, _ in padded[:-1])
    bytes_accessed = (B_pad * d_pad * in_itemsize + weight_bytes
                      + B_pad * out_pad * out_itemsize)

    out_flat = pl.pallas_call(
        make_mlp_kernel(n_linear, compute_dtype),
        out_shape=jax.ShapeDtypeStruct((B_pad, out_pad), out_dtype),
        grid=(B_pad // tm,),
        in_specs=in_specs,
        out_specs=out_specs,
        compiler_params=pltpu.CompilerParams(
            dimension_semantics=("parallel",)),
        cost_estimate=pl.CostEstimate(
            flops=flops,
            transcendentals=transcendentals,
            bytes_accessed=bytes_accessed),
    )(*flat_args)

    if B_pad != B or out_pad != d:
        out_flat = out_flat[:B, :d]
    return out_flat.reshape(B, c, h, w)        # == .view(-1, c, h, w)


def mlp_reference(x, params, shape):
    """Pure-JAX f32 reference for correctness checking."""
    c, h, w = shape
    B = x.shape[0]
    hcur = x.reshape(B, c * h * w)
    for i, (W, b) in enumerate(params):
        hcur = hcur @ W + b
        if i < len(params) - 1:
            hcur = _softplus(hcur)
    return hcur.reshape(B, c, h, w)


if __name__ == "__main__":
    shape = (4, 16, 16)          # (C, H, W) -> flattened dim 1024 (lane multiple)
    num_layers = 3
    num_units = 16
    B = 2

    key = jax.random.PRNGKey(0)
    key, kx, kx2 = jax.random.split(key, 3)
    x = jax.random.normal(kx, (B,) + shape, dtype=jnp.float32)
    params = init_mlp_params(key, shape, num_layers=num_layers,
                             num_units=num_units)

    ref = mlp_reference(x, params, shape)

    # Bit-faithful path (f32 operands): tight tolerance.
    out_f32 = jax.block_until_ready(
        mlp_forward(x, params, shape, compute_dtype=jnp.float32))
    assert out_f32.shape == (B,) + shape
    assert jnp.allclose(out_f32, ref, atol=1e-5, rtol=1e-5), "f32 mismatch"

    # Fast path (default): bf16 input/weight DMA, f32 accumulation.
    out_bf16 = jax.block_until_ready(mlp_forward(x, params, shape))
    assert jnp.allclose(out_bf16, ref, atol=5e-2, rtol=5e-2), "bf16 mismatch"

    # Larger batch: B=256 -> tm=64, 4 grid steps (>= 2 per v7x TensorCore),
    # exercising the pipelined / megacore-sharded path with no pad/slice copies.
    xb = jax.random.normal(kx2, (256,) + shape, dtype=jnp.float32)
    refb = mlp_reference(xb, params, shape)
    outb = jax.block_until_ready(mlp_forward(xb, params, shape))
    assert outb.shape == (256,) + shape
    assert jnp.allclose(outb, refb, atol=5e-2, rtol=5e-2), "batched mismatch"

    print("KERNEL_OK")
</pallas_src>

<mosaic_0001>
module attributes {stable_mosaic.version = 11 : i64} {
  func.func @kernel(%arg0: i32, %arg1: memref<2x1024xf32, #tpu.memory_space<vmem>>, %arg2: memref<1024x128xf32, #tpu.memory_space<vmem>>, %arg3: memref<1x128xf32, #tpu.memory_space<vmem>>, %arg4: memref<128x128xf32, #tpu.memory_space<vmem>>, %arg5: memref<1x128xf32, #tpu.memory_space<vmem>>, %arg6: memref<128x1024xf32, #tpu.memory_space<vmem>>, %arg7: memref<1x1024xf32, #tpu.memory_space<vmem>>, %arg8: memref<2x1024xf32, #tpu.memory_space<vmem>>) attributes {dimension_semantics = [#tpu.dimension_semantics<parallel>], iteration_bounds = array<i64: 1>, scalar_prefetch = 0 : i64, scratch_operands = 0 : i64, tpu.core_type = #tpu.core_type<tc>, window_params = [{transform_indices = @transform_0, window_bounds = array<i64: 2, 1024>}, {pipeline_mode = #tpu.pipeline_mode<synchronous>, transform_indices = @transform_1, window_bounds = array<i64: 1024, 128>}, {pipeline_mode = #tpu.pipeline_mode<synchronous>, transform_indices = @transform_2, window_bounds = array<i64: 1, 128>}, {pipeline_mode = #tpu.pipeline_mode<synchronous>, transform_indices = @transform_3, window_bounds = array<i64: 128, 128>}, {pipeline_mode = #tpu.pipeline_mode<synchronous>, transform_indices = @transform_4, window_bounds = array<i64: 1, 128>}, {pipeline_mode = #tpu.pipeline_mode<synchronous>, transform_indices = @transform_5, window_bounds = array<i64: 128, 1024>}, {pipeline_mode = #tpu.pipeline_mode<synchronous>, transform_indices = @transform_6, window_bounds = array<i64: 1, 1024>}, {transform_indices = @transform_7, window_bounds = array<i64: 2, 1024>}]} {
    %c0 = arith.constant 0 : index
    %c0_0 = arith.constant 0 : index
    %0 = vector.load %arg1[%c0, %c0_0] : memref<2x1024xf32, #tpu.memory_space<vmem>>, vector<2x1024xf32>
    %c0_1 = arith.constant 0 : index
    %c0_2 = arith.constant 0 : index
    %1 = vector.load %arg2[%c0_1, %c0_2] : memref<1024x128xf32, #tpu.memory_space<vmem>>, vector<1024x128xf32>
    %c0_3 = arith.constant 0 : index
    %c0_4 = arith.constant 0 : index
    %2 = vector.load %arg3[%c0_3, %c0_4] : memref<1x128xf32, #tpu.memory_space<vmem>>, vector<1x128xf32>
    %cst = arith.constant dense<0.000000e+00> : vector<2x128xf32>
    %3 = tpu.matmul %0, %1, %cst {dimension_numbers = #tpu.dot_dimension_numbers<[1], [0], [0], [1], [0, 0, 1, 1], [], []>} : vector<2x1024xf32>, vector<1024x128xf32>, vector<2x128xf32> -> vector<2x128xf32>
    %4 = vector.broadcast %2 : vector<1x128xf32> to vector<2x128xf32>
    %5 = arith.addf %3, %4 : vector<2x128xf32>
    %cst_5 = arith.constant 0.000000e+00 : f32
    %6 = vector.broadcast %cst_5 : f32 to vector<2x128xf32>
    %7 = arith.maximumf %5, %6 : vector<2x128xf32>
    %8 = math.absf %5 : vector<2x128xf32>
    %cst_6 = arith.constant 0.000000e+00 : f32
    %9 = vector.broadcast %cst_6 : f32 to vector<2x128xf32>
    %10 = arith.subf %9, %8 : vector<2x128xf32>
    %11 = math.exp %10 : vector<2x128xf32>
    %12 = math.log1p %11 : vector<2x128xf32>
    %13 = arith.addf %7, %12 : vector<2x128xf32>
    %c0_7 = arith.constant 0 : index
    %c0_8 = arith.constant 0 : index
    %14 = vector.load %arg4[%c0_7, %c0_8] : memref<128x128xf32, #tpu.memory_space<vmem>>, vector<128x128xf32>
    %c0_9 = arith.constant 0 : index
    %c0_10 = arith.constant 0 : index
    %15 = vector.load %arg5[%c0_9, %c0_10] : memref<1x128xf32, #tpu.memory_space<vmem>>, vector<1x128xf32>
    %cst_11 = arith.constant dense<0.000000e+00> : vector<2x128xf32>
    %16 = tpu.matmul %13, %14, %cst_11 {dimension_numbers = #tpu.dot_dimension_numbers<[1], [0], [0], [1], [0, 0, 1, 1], [], []>} : vector<2x128xf32>, vector<128x128xf32>, vector<2x128xf32> -> vector<2x128xf32>
    %17 = vector.broadcast %15 : vector<1x128xf32> to vector<2x128xf32>
    %18 = arith.addf %16, %17 : vector<2x128xf32>
    %cst_12 = arith.constant 0.000000e+00 : f32
    %19 = vector.broadcast %cst_12 : f32 to vector<2x128xf32>
    %20 = arith.maximumf %18, %19 : vector<2x128xf32>
    %21 = math.absf %18 : vector<2x128xf32>
    %cst_13 = arith.constant 0.000000e+00 : f32
    %22 = vector.broadcast %cst_13 : f32 to vector<2x128xf32>
    %23 = arith.subf %22, %21 : vector<2x128xf32>
    %24 = math.exp %23 : vector<2x128xf32>
    %25 = math.log1p %24 : vector<2x128xf32>
    %26 = arith.addf %20, %25 : vector<2x128xf32>
    %c0_14 = arith.constant 0 : index
    %c0_15 = arith.constant 0 : index
    %27 = vector.load %arg6[%c0_14, %c0_15] : memref<128x1024xf32, #tpu.memory_space<vmem>>, vector<128x1024xf32>
    %c0_16 = arith.constant 0 : index
    %c0_17 = arith.constant 0 : index
    %28 = vector.load %arg7[%c0_16, %c0_17] : memref<1x1024xf32, #tpu.memory_space<vmem>>, vector<1x1024xf32>
    %cst_18 = arith.constant dense<0.000000e+00> : vector<2x1024xf32>
    %29 = tpu.matmul %26, %27, %cst_18 {dimension_numbers = #tpu.dot_dimension_numbers<[1], [0], [0], [1], [0, 0, 1, 1], [], []>} : vector<2x128xf32>, vector<128x1024xf32>, vector<2x1024xf32> -> vector<2x1024xf32>
    %30 = vector.broadcast %28 : vector<1x1024xf32> to vector<2x1024xf32>
    %31 = arith.addf %29, %30 : vector<2x1024xf32>
    %c0_19 = arith.constant 0 : index
    %c0_20 = arith.constant 0 : index
    %32 = vector.load %arg8[%c0_19, %c0_20] : memref<2x1024xf32, #tpu.memory_space<vmem>>, vector<2x1024xf32>
    tpu.vector_store %arg8[%c0_19, %c0_20], %31 {strides = array<i32>} : memref<2x1024xf32, #tpu.memory_space<vmem>>, vector<2x1024xf32>,
    return
  }
  func.func @transform_0(%arg0: i32) -> (i32, i32) {
    %c0_i32 = arith.constant 0 : i32
    %c0_i32_0 = arith.constant 0 : i32
    return %arg0, %c0_i32 : i32, i32
  }
  func.func @transform_1(%arg0: i32) -> (i32, i32) {
    %c0_i32 = arith.constant 0 : i32
    %c0_i32_0 = arith.constant 0 : i32
    %c0_i32_1 = arith.constant 0 : i32
    return %c0_i32, %c0_i32_0 : i32, i32
  }
  func.func @transform_2(%arg0: i32) -> (i32, i32) {
    %c0_i32 = arith.constant 0 : i32
    %c0_i32_0 = arith.constant 0 : i32
    %c0_i32_1 = arith.constant 0 : i32
    return %c0_i32, %c0_i32_0 : i32, i32
  }
  func.func @transform_3(%arg0: i32) -> (i32, i32) {
    %c0_i32 = arith.constant 0 : i32
    %c0_i32_0 = arith.constant 0 : i32
    %c0_i32_1 = arith.constant 0 : i32
    return %c0_i32, %c0_i32_0 : i32, i32
  }
  func.func @transform_4(%arg0: i32) -> (i32, i32) {
    %c0_i32 = arith.constant 0 : i32
    %c0_i32_0 = arith.constant 0 : i32
    %c0_i32_1 = arith.constant 0 : i32
    return %c0_i32, %c0_i32_0 : i32, i32
  }
  func.func @transform_5(%arg0: i32) -> (i32, i32) {
    %c0_i32 = arith.constant 0 : i32
    %c0_i32_0 = arith.constant 0 : i32
    %c0_i32_1 = arith.constant 0 : i32
    return %c0_i32, %c0_i32_0 : i32, i32
  }
  func.func @transform_6(%arg0: i32) -> (i32, i32) {
    %c0_i32 = arith.constant 0 : i32
    %c0_i32_0 = arith.constant 0 : i32
    %c0_i32_1 = arith.constant 0 : i32
    return %c0_i32, %c0_i32_0 : i32, i32
  }
  func.func @transform_7(%arg0: i32) -> (i32, i32) {
    %c0_i32 = arith.constant 0 : i32
    %c0_i32_0 = arith.constant 0 : i32
    return %arg0, %c0_i32 : i32, i32
  }
}

</mosaic_0001>

<bundles_post_ra>
// kernel: tpu_custom_call.1
= control target key start
LH: loop header
LB: loop body
LE: loop exit
PB: predicated region body
PF: predicated region fallthrough
CT: control target
= control target key end

     0   :  { %12 = vsyncpa [#allocation3], 0  ;;  %s1094_s0 = inlined_call_operand.hbm [shape: f32[2,1024], index: 0, kind: input, shape index: {}]   ;;  %s1095_s1 = inlined_call_operand.hbm [shape: f32[1024,128], index: 1, kind: input, shape index: {}]   ;;  %s1096_s2 = inlined_call_operand.vmem [shape: f32[1,128], index: 2, kind: input, shape index: {}]   ;;  %s1097_s3 = inlined_call_operand.hbm [shape: f32[128,128], index: 3, kind: input, shape index: {}]   ;;  %s1098_s4 = inlined_call_operand.vmem [shape: f32[1,128], index: 4, kind: input, shape index: {}]   ;;  %s1099_s5 = inlined_call_operand.hbm [shape: f32[128,1024], index: 5, kind: input, shape index: {}]   ;;  %s1100_s6 = inlined_call_operand.hbm [shape: f32[1,1024], index: 6, kind: input, shape index: {}]   ;;  %s1101_s7 = inlined_call_operand.hbm [shape: f32[2,1024], index: 7, kind: output, shape index: {}]  }
   0x1   :  { %13 = vsyncpa [#allocation6], 0 }
   0x2   :  { %14 = vsyncpa [#allocation9], 0  ;;  %s31_s26 = sshll.u32 %s1095_s1, 4  ;;  %s32_s26 = int_to_ptr.hbm [resolvable:$true] %s31_s26 }
   0x3   :  { %15 = vsyncpa [#allocation4], 0  ;;  %s1010_s27 = smov [#allocation5]   ;;  %s61_s8 = sshll.u32 %s1099_s5, 4  ;;  %s62_s8 = int_to_ptr.hbm [resolvable:$true] %s61_s8 }
   0x4   :  { %s33_s28 = sshll.u32 %s1010_s27, 4  ;;  %s1011_s9 = smov 128   ;;  %s34_s28 = int_to_ptr.vmem [resolvable:$true] %s33_s28 }
   0x5   :  { %s1012_s10 = smov 8   ;;  %s1013_s11 = smov [#allocation8]  }
   0x6   :  { %39 = dma.hbm_to_vmem [thread:$0]  %s32_s26, 16384, %s34_s28, [#allocation6], %s1011_s9, %s1011_s9, %s1012_s10  }
   0x7   :  { %s63_s12 = sshll.u32 %s1013_s11, 4  ;;  %s1014_s13 = smov 1024   ;;  %s64_s12 = int_to_ptr.vmem [resolvable:$true] %s63_s12 }
   0x8   :  { %s1015_s14 = smov 64   ;;  %s21_s16 = sshll.u32 %s1094_s0, 4  ;;  %s22_s16 = int_to_ptr.hbm [resolvable:$true] %s21_s16 }
   0x9   :  { %69 = dma.hbm_to_vmem [thread:$0]  %s62_s8, 16384, %s64_s12, [#allocation9], %s1014_s13, %s1014_s13, %s1015_s14  }
   0xa   :  { %s1016_s17 = smov [#allocation2]   ;;  %s46_s20 = sshll.u32 %s1097_s3, 4  ;;  %s47_s20 = int_to_ptr.hbm [resolvable:$true] %s46_s20 }
   0xb   :  { %s23_s18 = sshll.u32 %s1016_s17, 4  ;;  %s1017_s21 = smov [#allocation7]   ;;  %s24_s18 = int_to_ptr.vmem [resolvable:$true] %s23_s18 }
   0xc   :  { %26 = dma.hbm_to_vmem [thread:$0]  %s22_s16, 256, %s24_s18, [#allocation3]  }
   0xd   :  { %s48_s22 = sshll.u32 %s1017_s21, 4  ;;  %s75_s25 = sshll.u32 %s1100_s6, 4  ;;  %s49_s22 = int_to_ptr.vmem [resolvable:$true] %s48_s22  ;;  %s76_s25 = int_to_ptr.hbm [resolvable:$true] %s75_s25 }
   0xe   :  { %54 = dma.hbm_to_vmem [thread:$0]  %s47_s20, 2048, %s49_s22, [#allocation6], %s1011_s9, %s1011_s9, %s1012_s10  }
   0xf   :  { %s1018_s0 = smov [#allocation10]  }
  0x10   :  { %s77_s26 = sshll.u32 %s1018_s0, 4  ;;  %s78_s26 = int_to_ptr.vmem [resolvable:$true] %s77_s26 }
  0x11   :  { %80 = dma.hbm_to_vmem [thread:$0]  %s76_s25, 128, %s78_s26, [#allocation9]  }
  0x12   :  { %1002 = dma.done.wait [#allocation3], 256  }
  0x13   :  { %1003 = vsyncadd [#allocation3], 4294967040 }
  0x14   :  { %1004 = dma.done.wait [#allocation6], 18432  }
  0x15   :  { %1005 = vsyncadd [#allocation6], 4294948864 }
  0x16   :  { %1006 = dma.done.wait [#allocation9], 16512  }
  0x17   :  { %1007 = vsyncadd [#allocation9], 4294950784  ;;  %v150_v0 = vld [vmem:[#allocation5 + $0x178] sm:$0xff]  ;;  %v149_v2 = vld [vmem:[#allocation5 + $0x170] sm:$0xff]  ;;  %vm806_vm2 = vcmask 1041408   ;;  %vm808_vm3 = vcmask 1045508  }
  0x18   :  { %v118_v1 = vld [vmem:[#allocation5 + $0x78] sm:$0xff]  ;;  %296 = vmatpush.msra.mxu2 %v150_v0  ;;  %v117_v4 = vld [vmem:[#allocation5 + $0x70] sm:$0xff]  ;;  %v148_v6 = vld [vmem:[#allocation5 + $0x168] sm:$0xff]  ;;  %vm810_vm4 = vcmask 1043456   ;;  %s826_s8 = sshll.u32 %s1101_s7, 4  ;;  %s827_s8 = int_to_ptr.hbm [resolvable:$true] %s826_s8 }
  0x19   :  { %256 = vmatpush.msra.mxu0 %v118_v1  ;;  %v166_v3 = vld [vmem:[#allocation5 + $0x1f8] sm:$0xff]  ;;  %v165_v7 = vld [vmem:[#allocation5 + $0x1f0] sm:$0xff]  ;;  %v116_v8 = vld [vmem:[#allocation5 + $0x68] sm:$0xff] }
  0x1a   :  { %v134_v5 = vld [vmem:[#allocation5 + $0xf8] sm:$0xff]  ;;  %316 = vmatpush.msra.mxu3 %v166_v3  ;;  %297 = vmatpush.msra.mxu2 %v149_v2  ;;  %v133_v9 = vld [vmem:[#allocation5 + $0xf0] sm:$0xff]  ;;  %v164_v10 = vld [vmem:[#allocation5 + $0x1e8] sm:$0xff] }
  0x1b   :  { %276 = vmatpush.msra.mxu1 %v134_v5  ;;  %257 = vmatpush.msra.mxu0 %v117_v4  ;;  %v147_v11 = vld [vmem:[#allocation5 + $0x160] sm:$0xff]  ;;  %v132_v13 = vld [vmem:[#allocation5 + $0xe8] sm:$0xff]  ;;  %v146_v16 = vld [vmem:[#allocation5 + $0x158] sm:$0xff] }
  0x1c   :  { %317 = vmatpush.msra.mxu3 %v165_v7  ;;  %v115_v12 = vld [vmem:[#allocation5 + $0x60] sm:$0xff]  ;;  %298 = vmatpush.msra.mxu2 %v148_v6  ;;  %v114_v17 = vld [vmem:[#allocation5 + $0x58] sm:$0xff]  ;;  %v145_v20 = vld [vmem:[#allocation5 + $0x150] sm:$0xff] }
  0x1d   :  { %277 = vmatpush.msra.mxu1 %v133_v9  ;;  %258 = vmatpush.msra.mxu0 %v116_v8  ;;  %v163_v14 = vld [vmem:[#allocation5 + $0x1e0] sm:$0xff]  ;;  %v162_v18 = vld [vmem:[#allocation5 + $0x1d8] sm:$0xff]  ;;  %v113_v21 = vld [vmem:[#allocation5 + $0x50] sm:$0xff] }
  0x1e   :  { %v131_v15 = vld [vmem:[#allocation5 + $0xe0] sm:$0xff]  ;;  %318 = vmatpush.msra.mxu3 %v164_v10  ;;  %299 = vmatpush.msra.mxu2 %v147_v11  ;;  %v130_v19 = vld [vmem:[#allocation5 + $0xd8] sm:$0xff]  ;;  %v161_v22 = vld [vmem:[#allocation5 + $0x1d0] sm:$0xff] }
  0x1f   :  { %278 = vmatpush.msra.mxu1 %v132_v13  ;;  %259 = vmatpush.msra.mxu0 %v115_v12  ;;  %v129_v23 = vld [vmem:[#allocation5 + $0xd0] sm:$0xff]  ;;  %v144_v24 = vld [vmem:[#allocation5 + $0x148] sm:$0xff]  ;;  %v143_v28 = vld [vmem:[#allocation5 + $0x140] sm:$0xff] }
  0x20   :  { %319 = vmatpush.msra.mxu3 %v163_v14  ;;  %300 = vmatpush.msra.mxu2 %v146_v16  ;;  %v112_v25 = vld [vmem:[#allocation5 + $0x48] sm:$0xff]  ;;  %v111_v29 = vld [vmem:[#allocation5 + $0x40] sm:$0xff]  ;;  %v142_v32 = vld [vmem:[#allocation5 + $0x138] sm:$0xff] }
  0x21   :  { %279 = vmatpush.msra.mxu1 %v131_v15  ;;  %260 = vmatpush.msra.mxu0 %v114_v17  ;;  %v160_v26 = vld [vmem:[#allocation5 + $0x1c8] sm:$0xff]  ;;  %v159_v30 = vld [vmem:[#allocation5 + $0x1c0] sm:$0xff]  ;;  %v110_v33 = vld [vmem:[#allocation5 + $0x38] sm:$0xff] }
  0x22   :  { %320 = vmatpush.msra.mxu3 %v162_v18  ;;  %301 = vmatpush.msra.mxu2 %v145_v20  ;;  %v128_v27 = vld [vmem:[#allocation5 + $0xc8] sm:$0xff]  ;;  %v127_v31 = vld [vmem:[#allocation5 + $0xc0] sm:$0xff]  ;;  %v158_v34 = vld [vmem:[#allocation5 + $0x1b8] sm:$0xff] }
  0x23   :  { %280 = vmatpush.msra.mxu1 %v130_v19  ;;  %261 = vmatpush.msra.mxu0 %v113_v21  ;;  %v126_v35 = vld [vmem:[#allocation5 + $0xb8] sm:$0xff]  ;;  %v141_v36 = vld [vmem:[#allocation5 + $0x130] sm:$0xff]  ;;  %v140_v40 = vld [vmem:[#allocation5 + $0x128] sm:$0xff] }
  0x24   :  { %321 = vmatpush.msra.mxu3 %v161_v22  ;;  %302 = vmatpush.msra.mxu2 %v144_v24  ;;  %v109_v37 = vld [vmem:[#allocation5 + $0x30] sm:$0xff]  ;;  %v108_v41 = vld [vmem:[#allocation5 + $0x28] sm:$0xff]  ;;  %v139_v44 = vld [vmem:[#allocation5 + $0x120] sm:$0xff] }
  0x25   :  { %281 = vmatpush.msra.mxu1 %v129_v23  ;;  %262 = vmatpush.msra.mxu0 %v112_v25  ;;  %v157_v38 = vld [vmem:[#allocation5 + $0x1b0] sm:$0xff]  ;;  %v156_v42 = vld [vmem:[#allocation5 + $0x1a8] sm:$0xff]  ;;  %v107_v45 = vld [vmem:[#allocation5 + $0x20] sm:$0xff] }
  0x26   :  { %322 = vmatpush.msra.mxu3 %v160_v26  ;;  %303 = vmatpush.msra.mxu2 %v143_v28  ;;  %v125_v39 = vld [vmem:[#allocation5 + $0xb0] sm:$0xff]  ;;  %v124_v43 = vld [vmem:[#allocation5 + $0xa8] sm:$0xff]  ;;  %v155_v46 = vld [vmem:[#allocation5 + $0x1a0] sm:$0xff] }
  0x27   :  { %282 = vmatpush.msra.mxu1 %v128_v27  ;;  %263 = vmatpush.msra.mxu0 %v111_v29  ;;  %v123_v47 = vld [vmem:[#allocation5 + $0xa0] sm:$0xff]  ;;  %v138_v48 = vld [vmem:[#allocation5 + $0x118] sm:$0xff]  ;;  %v137_v52 = vld [vmem:[#allocation5 + $0x110] sm:$0xff] }
  0x28   :  { %323 = vmatpush.msra.mxu3 %v159_v30  ;;  %304 = vmatpush.msra.mxu2 %v142_v32  ;;  %v106_v49 = vld [vmem:[#allocation5 + $0x18] sm:$0xff]  ;;  %v105_v53 = vld [vmem:[#allocation5 + $0x10] sm:$0xff]  ;;  %v136_v56 = vld [vmem:[#allocation5 + $0x108] sm:$0xff] }
  0x29   :  { %283 = vmatpush.msra.mxu1 %v127_v31  ;;  %264 = vmatpush.msra.mxu0 %v110_v33  ;;  %v154_v50 = vld [vmem:[#allocation5 + $0x198] sm:$0xff]  ;;  %v153_v54 = vld [vmem:[#allocation5 + $0x190] sm:$0xff]  ;;  %v104_v57 = vld [vmem:[#allocation5 + $0x8] sm:$0xff] }
  0x2a   :  { %324 = vmatpush.msra.mxu3 %v158_v34  ;;  %305 = vmatpush.msra.mxu2 %v141_v36  ;;  %v122_v51 = vld [vmem:[#allocation5 + $0x98] sm:$0xff]  ;;  %v121_v55 = vld [vmem:[#allocation5 + $0x90] sm:$0xff]  ;;  %v152_v58 = vld [vmem:[#allocation5 + $0x188] sm:$0xff] }
  0x2b   :  { %284 = vmatpush.msra.mxu1 %v126_v35  ;;  %265 = vmatpush.msra.mxu0 %v109_v37  ;;  %v120_v59 = vld [vmem:[#allocation5 + $0x88] sm:$0xff]  ;;  %v135_v60 = vld [vmem:[#allocation5 + $0x100] sm:$0xff]  ;;  %v214_v62 = vld [vmem:[#allocation5 + $0x378] sm:$0xff] }
  0x2c   :  { %325 = vmatpush.msra.mxu3 %v157_v38  ;;  %306 = vmatpush.msra.mxu2 %v140_v40  ;;  %v103_v61 = vld [vmem:[#allocation5] sm:$0xff]  ;;  %v182_v0 = vld [vmem:[#allocation5 + $0x278] sm:$0xff]  ;;  %v213_v2 = vld [vmem:[#allocation5 + $0x370] sm:$0xff] }
  0x2d   :  { %285 = vmatpush.msra.mxu1 %v125_v39  ;;  %266 = vmatpush.msra.mxu0 %v108_v41  ;;  %v151_v63 = vld [vmem:[#allocation5 + $0x180] sm:$0xff]  ;;  %v230_v1 = vld [vmem:[#allocation5 + $0x3f8] sm:$0xff]  ;;  %v181_v4 = vld [vmem:[#allocation5 + $0x270] sm:$0xff] }
  0x2e   :  { %326 = vmatpush.msra.mxu3 %v156_v42  ;;  %307 = vmatpush.msra.mxu2 %v139_v44  ;;  %v119_v3 = vld [vmem:[#allocation5 + $0x80] sm:$0xff]  ;;  %v198_v5 = vld [vmem:[#allocation5 + $0x2f8] sm:$0xff]  ;;  %v212_v6 = vld [vmem:[#allocation5 + $0x368] sm:$0xff] }
  0x2f   :  { %286 = vmatpush.msra.mxu1 %v124_v43  ;;  %267 = vmatpush.msra.mxu0 %v107_v45  ;;  %v229_v7 = vld [vmem:[#allocation5 + $0x3f0] sm:$0xff]  ;;  %v180_v8 = vld [vmem:[#allocation5 + $0x268] sm:$0xff]  ;;  %v211_v10 = vld [vmem:[#allocation5 + $0x360] sm:$0xff] }
  0x30   :  { %327 = vmatpush.msra.mxu3 %v155_v46  ;;  %308 = vmatpush.msra.mxu2 %v138_v48  ;;  %v197_v9 = vld [vmem:[#allocation5 + $0x2f0] sm:$0xff]  ;;  %v228_v11 = vld [vmem:[#allocation5 + $0x3e8] sm:$0xff]  ;;  %v179_v12 = vld [vmem:[#allocation5 + $0x260] sm:$0xff] }
  0x31   :  { %287 = vmatpush.msra.mxu1 %v123_v47  ;;  %268 = vmatpush.msra.mxu0 %v106_v49  ;;  %v196_v13 = vld [vmem:[#allocation5 + $0x2e8] sm:$0xff]  ;;  %v101_v14 = vld [vmem:[#allocation2] sm:$0xff]  ;;  %v210_v15 = vld [vmem:[#allocation5 + $0x358] sm:$0xff] }
  0x32   :  { %328 = vmatpush.msra.mxu3 %v154_v50  ;;  %309 = vmatpush.msra.mxu2 %v137_v52  ;;  %v227_v16 = vld [vmem:[#allocation5 + $0x3e0] sm:$0xff]  ;;  %237 = vst [vmem:[#allocation1] ss:$4 sm:$0xff] %v101_v14  ;;  %v178_v17 = vld [vmem:[#allocation5 + $0x258] sm:$0xff]  ;;  %v209_v19 = vld [vmem:[#allocation5 + $0x350] sm:$0xff] }
  0x33   :  { %288 = vmatpush.msra.mxu1 %v122_v51  ;;  %269 = vmatpush.msra.mxu0 %v105_v53  ;;  %v195_v18 = vld [vmem:[#allocation5 + $0x2e0] sm:$0xff]  ;;  %v226_v20 = vld [vmem:[#allocation5 + $0x3d8] sm:$0xff]  ;;  %v177_v21 = vld [vmem:[#allocation5 + $0x250] sm:$0xff] }
  0x34   :  { %329 = vmatpush.msra.mxu3 %v153_v54  ;;  %310 = vmatpush.msra.mxu2 %v136_v56  ;;  %v194_v22 = vld [vmem:[#allocation5 + $0x2d8] sm:$0xff]  ;;  %v208_v23 = vld [vmem:[#allocation5 + $0x348] sm:$0xff]  ;;  %v225_v24 = vld [vmem:[#allocation5 + $0x3d0] sm:$0xff] }
  0x35   :  { %289 = vmatpush.msra.mxu1 %v121_v55  ;;  %270 = vmatpush.msra.mxu0 %v104_v57  ;;  %v102_v25 = vld [vmem:[#allocation2 + $0x8] sm:$0xff]  ;;  %v176_v26 = vld [vmem:[#allocation5 + $0x248] sm:$0xff]  ;;  %v193_v27 = vld [vmem:[#allocation5 + $0x2d0] sm:$0xff] }
  0x36   :  { %330 = vmatpush.msra.mxu3 %v152_v58  ;;  %311 = vmatpush.msra.mxu2 %v135_v60  ;;  %239 = vst [vmem:[#allocation1 + $0x20] ss:$4 sm:$0xff] %v102_v25  ;;  %v207_v28 = vld [vmem:[#allocation5 + $0x340] sm:$0xff]  ;;  %v224_v29 = vld [vmem:[#allocation5 + $0x3c8] sm:$0xff]  ;;  %v206_v32 = vld [vmem:[#allocation5 + $0x338] sm:$0xff] }
  0x37   :  { %290 = vmatpush.msra.mxu1 %v120_v59  ;;  %271 = vmatpush.msra.mxu0 %v103_v61  ;;  %v175_v30 = vld [vmem:[#allocation5 + $0x240] sm:$0xff]  ;;  %v192_v31 = vld [vmem:[#allocation5 + $0x2c8] sm:$0xff]  ;;  %v174_v34 = vld [vmem:[#allocation5 + $0x238] sm:$0xff] }
  0x38   :  { %376 = vmatpush.msrb.mxu2 %v214_v62  ;;  %331 = vmatpush.msra.mxu3 %v151_v63  ;;  %v223_v33 = vld [vmem:[#allocation5 + $0x3c0] sm:$0xff]  ;;  %v205_v36 = vld [vmem:[#allocation5 + $0x330] sm:$0xff]  ;;  %v222_v37 = vld [vmem:[#allocation5 + $0x3b8] sm:$0xff] }
  0x39   :  { %336 = vmatpush.msrb.mxu0 %v182_v0  ;;  %291 = vmatpush.msra.mxu1 %v119_v3  ;;  %v191_v35 = vld [vmem:[#allocation5 + $0x2c0] sm:$0xff]  ;;  %v173_v38 = vld [vmem:[#allocation5 + $0x230] sm:$0xff]  ;;  %v190_v39 = vld [vmem:[#allocation5 + $0x2b8] sm:$0xff] }
  0x3a   :  { %396 = vmatpush.msrb.mxu3 %v230_v1  ;;  %377 = vmatpush.msrb.mxu2 %v213_v2  ;;  %v204_v40 = vld [vmem:[#allocation5 + $0x328] sm:$0xff]  ;;  %v221_v41 = vld [vmem:[#allocation5 + $0x3b0] sm:$0xff]  ;;  %v203_v44 = vld [vmem:[#allocation5 + $0x320] sm:$0xff] }
  0x3b   :  { %337 = vmatpush.msrb.mxu0 %v181_v4  ;;  %356 = vmatpush.msrb.mxu1 %v198_v5  ;;  %v172_v42 = vld [vmem:[#allocation5 + $0x228] sm:$0xff]  ;;  %v189_v43 = vld [vmem:[#allocation5 + $0x2b0] sm:$0xff]  ;;  %v242_v46 = vld.sshfl [vmem:[#allocation1 + $0x10] sm:$0xff pattern:$0x73625140] }
  0x3c   :  { %378 = vmatpush.msrb.mxu2 %v212_v6  ;;  %397 = vmatpush.msrb.mxu3 %v229_v7  ;;  %v220_v45 = vld [vmem:[#allocation5 + $0x3a8] sm:$0xff]  ;;  %v171_v47 = vld [vmem:[#allocation5 + $0x220] sm:$0xff]  ;;  %v202_v49 = vld [vmem:[#allocation5 + $0x318] sm:$0xff] }
  0x3d   :  { %338 = vmatpush.msrb.mxu0 %v180_v8  ;;  %357 = vmatpush.msrb.mxu1 %v197_v9  ;;  %v188_v48 = vld [vmem:[#allocation5 + $0x2a8] sm:$0xff]  ;;  %v219_v50 = vld [vmem:[#allocation5 + $0x3a0] sm:$0xff]  ;;  %v170_v53 = vld [vmem:[#allocation5 + $0x218] sm:$0xff] }
  0x3e   :  { %379 = vmatpush.msrb.mxu2 %v211_v10  ;;  %398 = vmatpush.msrb.mxu3 %v228_v11  ;;  %v240_v51 = vld.sshfl [vmem:[#allocation1] sm:$0xff pattern:$0x73625140]  ;;  %v243_v52 = vld.sshfl [vmem:[#allocation1 + $0x18] sm:$0xff pattern:$0x73625140] }
  0x3f   :  { %339 = vmatpush.msrb.mxu0 %v179_v12  ;;  %358 = vmatpush.msrb.mxu1 %v196_v13  ;;  %v187_v54 = vld [vmem:[#allocation5 + $0x2a0] sm:$0xff]  ;;  %v201_v55 = vld [vmem:[#allocation5 + $0x310] sm:$0xff]  ;;  %v218_v56 = vld [vmem:[#allocation5 + $0x398] sm:$0xff] }
  0x40   :  { %380 = vmatpush.msrb.mxu2 %v210_v15  ;;  %399 = vmatpush.msrb.mxu3 %v227_v16  ;;  %v241_v57 = vld.sshfl [vmem:[#allocation1 + $0x8] sm:$0xff pattern:$0x73625140]  ;;  %v186_v59 = vld [vmem:[#allocation5 + $0x298] sm:$0xff]  ;;  %v200_v60 = vld [vmem:[#allocation5 + $0x308] sm:$0xff] }
  0x41   :  { %340 = vmatpush.msrb.mxu0 %v178_v17  ;;  %359 = vmatpush.msrb.mxu1 %v195_v18  ;;  %v169_v58 = vld [vmem:[#allocation5 + $0x210] sm:$0xff]  ;;  %v168_v62 = vld [vmem:[#allocation5 + $0x208] sm:$0xff]  ;;  %v199_v0 = vld [vmem:[#allocation5 + $0x300] sm:$0xff] }
  0x42   :  { %381 = vmatpush.msrb.mxu2 %v209_v19  ;;  %400 = vmatpush.msrb.mxu3 %v226_v20  ;;  %v217_v61 = vld [vmem:[#allocation5 + $0x390] sm:$0xff]  ;;  %v216_v1 = vld [vmem:[#allocation5 + $0x388] sm:$0xff]  ;;  %v246_v2 = vld.sshfl [vmem:[#allocation1 + $0x30] sm:$0xff pattern:$0x73625140] }
  0x43   :  { %341 = vmatpush.msrb.mxu0 %v177_v21  ;;  %360 = vmatpush.msrb.mxu1 %v194_v22  ;;  %v185_v63 = vld [vmem:[#allocation5 + $0x290] sm:$0xff]  ;;  %v167_v3 = vld [vmem:[#allocation5 + $0x200] sm:$0xff]  ;;  %v184_v4 = vld [vmem:[#allocation5 + $0x288] sm:$0xff] }
  0x44   :  { %382 = vmatpush.msrb.mxu2 %v208_v23  ;;  %401 = vmatpush.msrb.mxu3 %v225_v24  ;;  %v215_v5 = vld [vmem:[#allocation5 + $0x380] sm:$0xff]  ;;  %v244_v6 = vld.sshfl [vmem:[#allocation1 + $0x20] sm:$0xff pattern:$0x73625140]  ;;  %v446_v10 = vld [vmem:[#allocation7 + $0x78] sm:$0xff] }
  0x45   :  { %342 = vmatpush.msrb.mxu0 %v176_v26  ;;  %361 = vmatpush.msrb.mxu1 %v193_v27  ;;  %v247_v7 = vld.sshfl [vmem:[#allocation1 + $0x38] sm:$0xff pattern:$0x73625140]  ;;  %v245_v9 = vld.sshfl [vmem:[#allocation1 + $0x28] sm:$0xff pattern:$0x73625140] }
  0x46   :  { %383 = vmatpush.msrb.mxu2 %v207_v28  ;;  %402 = vmatpush.msrb.mxu3 %v224_v29  ;;  %v183_v8 = vld [vmem:[#allocation5 + $0x280] sm:$0xff]  ;;  %v445_v11 = vld [vmem:[#allocation7 + $0x70] sm:$0xff]  ;;  %v444_v12 = vld [vmem:[#allocation7 + $0x68] sm:$0xff] }
  0x47   :  { %343 = vmatpush.msrb.mxu0 %v175_v30  ;;  %362 = vmatpush.msrb.mxu1 %v192_v31  ;;  %v443_v13 = vld [vmem:[#allocation7 + $0x60] sm:$0xff]  ;;  %v442_v14 = vld [vmem:[#allocation7 + $0x58] sm:$0xff]  ;;  %v441_v15 = vld [vmem:[#allocation7 + $0x50] sm:$0xff] }
  0x48   :  { %384 = vmatpush.msrb.mxu2 %v206_v32  ;;  %403 = vmatpush.msrb.mxu3 %v223_v33  ;;  %v440_v16 = vld [vmem:[#allocation7 + $0x48] sm:$0xff]  ;;  %v439_v17 = vld [vmem:[#allocation7 + $0x40] sm:$0xff]  ;;  %v438_v19 = vld [vmem:[#allocation7 + $0x38] sm:$0xff] }
  0x49   :  { %344 = vmatpush.msrb.mxu0 %v174_v34  ;;  %363 = vmatpush.msrb.mxu1 %v191_v35  ;;  %v848_v18 = vld [vmem:[%s1096_s2] ss:$0 sm:$0xff]  ;;  %v437_v21 = vld [vmem:[#allocation7 + $0x30] sm:$0xff]  ;;  %v435_v27 = vld [vmem:[#allocation7 + $0x20] sm:$0xff] }
  0x4a   :  { %385 = vmatpush.msrb.mxu2 %v205_v36  ;;  %404 = vmatpush.msrb.mxu3 %v222_v37  ;;  %v436_v23 = vld [vmem:[#allocation7 + $0x28] sm:$0xff]  ;;  %v434_v29 = vld [vmem:[#allocation7 + $0x18] sm:$0xff]  ;;  %v433_v32 = vld [vmem:[#allocation7 + $0x10] sm:$0xff] }
  0x4b   :  { %345 = vmatpush.msrb.mxu0 %v173_v38  ;;  %364 = vmatpush.msrb.mxu1 %v190_v39  ;;  %v432_v34 = vld [vmem:[#allocation7 + $0x8] sm:$0xff]  ;;  %v431_v37 = vld [vmem:[#allocation7] sm:$0xff] }
  0x4c   :  { %386 = vmatpush.msrb.mxu2 %v204_v40  ;;  %405 = vmatpush.msrb.mxu3 %v221_v41  ;;  %v606_v40 = vld [vmem:[#allocation8 + $0x3c0] sm:$0xff]  ;;  %v607_v41 = vld [vmem:[#allocation8 + $0x3c8] sm:$0xff] }
  0x4d   :  { %346 = vmatpush.msrb.mxu0 %v172_v42  ;;  %365 = vmatpush.msrb.mxu1 %v189_v43  ;;  %v608_v42 = vld [vmem:[#allocation8 + $0x3d0] sm:$0xff] }
  0x4e   :  { %387 = vmatpush.msrb.mxu2 %v203_v44  ;;  %406 = vmatpush.msrb.mxu3 %v220_v45  ;;  %v609_v44 = vld [vmem:[#allocation8 + $0x3d8] sm:$0xff]  ;;  %v598_v45 = vld [vmem:[#allocation8 + $0x380] sm:$0xff] }
  0x4f   :  { %312 = vmatmul.f32.vlgmr.msra.gmra.mxu2 %v242_v46  ;;  %347 = vmatpush.msrb.mxu0 %v171_v47  ;;  %v599_v46 = vld [vmem:[#allocation8 + $0x388] sm:$0xff] }
  0x50   :  { %366 = vmatpush.msrb.mxu1 %v188_v48  ;;  %388 = vmatpush.msrb.mxu2 %v202_v49  ;;  %v600_v48 = vld [vmem:[#allocation8 + $0x390] sm:$0xff]  ;;  %v601_v49 = vld [vmem:[#allocation8 + $0x398] sm:$0xff] }
  0x51   :  { %407 = vmatpush.msrb.mxu3 %v219_v50  ;;  %272 = vmatmul.f32.vlgmr.msra.gmra.mxu0 %v240_v51  ;;  %v590_v50 = vld [vmem:[#allocation8 + $0x340] sm:$0xff] }
  0x52   :  { %332 = vmatmul.f32.vlgmr.msra.gmra.mxu3 %v243_v52  ;;  %348 = vmatpush.msrb.mxu0 %v170_v53  ;;  %v591_v52 = vld [vmem:[#allocation8 + $0x348] sm:$0xff]  ;;  %v592_v53 = vld [vmem:[#allocation8 + $0x350] sm:$0xff] }
  0x53   :  { %367 = vmatpush.msrb.mxu1 %v187_v54  ;;  %389 = vmatpush.msrb.mxu2 %v201_v55  ;;  %v593_v54 = vld [vmem:[#allocation8 + $0x358] sm:$0xff]  ;;  %v582_v55 = vld [vmem:[#allocation8 + $0x300] sm:$0xff] }
  0x54   :  { %408 = vmatpush.msrb.mxu3 %v218_v56  ;;  %292 = vmatmul.f32.vlgmr.msra.gmra.mxu1 %v241_v57  ;;  %v583_v56 = vld [vmem:[#allocation8 + $0x308] sm:$0xff] }
  0x55   :  { %349 = vmatpush.msrb.mxu0 %v169_v58  ;;  %368 = vmatpush.msrb.mxu1 %v186_v59  ;;  %v584_v58 = vld [vmem:[#allocation8 + $0x310] sm:$0xff]  ;;  %v585_v59 = vld [vmem:[#allocation8 + $0x318] sm:$0xff] }
  0x56   :  { %390 = vmatpush.msrb.mxu2 %v200_v60  ;;  %409 = vmatpush.msrb.mxu3 %v217_v61  ;;  %v574_v60 = vld [vmem:[#allocation8 + $0x2c0] sm:$0xff]  ;;  %v575_v61 = vld [vmem:[#allocation8 + $0x2c8] sm:$0xff] }
  0x57   :  { %350 = vmatpush.msrb.mxu0 %v168_v62  ;;  %369 = vmatpush.msrb.mxu1 %v185_v63  ;;  %v576_v63 = vld [vmem:[#allocation8 + $0x2d0] sm:$0xff] }
  0x58   :  { %391 = vmatpush.msrb.mxu2 %v199_v0  ;;  %410 = vmatpush.msrb.mxu3 %v216_v1  ;;  %v577_v0 = vld [vmem:[#allocation8 + $0x2d8] sm:$0xff]  ;;  %v566_v1 = vld [vmem:[#allocation8 + $0x280] sm:$0xff] }
  0x59   :  { %392 = vmatmul.f32.vlgmr.msrb.gmra.mxu2 %v246_v2  ;;  %351 = vmatpush.msrb.mxu0 %v167_v3  ;;  %v567_v2 = vld [vmem:[#allocation8 + $0x288] sm:$0xff] }
  0x5a   :  { %370 = vmatpush.msrb.mxu1 %v184_v4  ;;  %411 = vmatpush.msrb.mxu3 %v215_v5  ;;  %v568_v4 = vld [vmem:[#allocation8 + $0x290] sm:$0xff]  ;;  %v569_v5 = vld [vmem:[#allocation8 + $0x298] sm:$0xff] }
  0x5b   :  { %352 = vmatmul.f32.vlgmr.msrb.gmra.mxu0 %v244_v6  ;;  %412 = vmatmul.f32.vlgmr.msrb.gmra.mxu3 %v247_v7  ;;  %v558_v6 = vld [vmem:[#allocation8 + $0x240] sm:$0xff]  ;;  %v559_v7 = vld [vmem:[#allocation8 + $0x248] sm:$0xff] }
  0x5c   :  { %371 = vmatpush.msrb.mxu1 %v183_v8  ;;  %451 = vmatpush.msra.mxu0 %v446_v10  ;;  %v560_v8 = vld [vmem:[#allocation8 + $0x250] sm:$0xff]  ;;  %v550_v10 = vld [vmem:[#allocation8 + $0x200] sm:$0xff] }
  0x5d   :  { %372 = vmatmul.f32.vlgmr.msrb.gmra.mxu1 %v245_v9  ;;  %652 = vmatpush.msra.mxu2 %v607_v41  ;;  %v561_v9 = vld [vmem:[#allocation8 + $0x258] sm:$0xff]  ;;  %v510_v41 = vld [vmem:[#allocation8 + $0xc0] sm:$0xff] }
  0x5e   :  { %452 = vmatpush.msra.mxu0 %v445_v11  ;;  %632 = vmatpush.msra.mxu1 %v606_v40  ;;  %v551_v11 = vld [vmem:[#allocation8 + $0x208] sm:$0xff] }
  0x5f   :  { %672 = vmatpush.msra.mxu3 %v608_v42  ;;  %653 = vmatpush.msra.mxu2 %v599_v46  ;;  %v511_v42 = vld [vmem:[#allocation8 + $0xc8] sm:$0xff] }
  0x60   :  { %453 = vmatpush.msra.mxu0 %v444_v12  ;;  %633 = vmatpush.msra.mxu1 %v598_v45  ;;  %v552_v12 = vld [vmem:[#allocation8 + $0x210] sm:$0xff]  ;;  %v502_v45 = vld [vmem:[#allocation8 + $0x80] sm:$0xff]  ;;  %v503_v46 = vld [vmem:[#allocation8 + $0x88] sm:$0xff] }
  0x61   :  { %673 = vmatpush.msra.mxu3 %v600_v48  ;;  %654 = vmatpush.msra.mxu2 %v591_v52  ;;  %v505_v48 = vld [vmem:[#allocation8 + $0x98] sm:$0xff] }
  0x62   :  { %454 = vmatpush.msra.mxu0 %v443_v13  ;;  %634 = vmatpush.msra.mxu1 %v590_v50  ;;  %v553_v13 = vld [vmem:[#allocation8 + $0x218] sm:$0xff]  ;;  %v495_v50 = vld [vmem:[#allocation8 + $0x48] sm:$0xff] }
  0x63   :  { %674 = vmatpush.msra.mxu3 %v592_v53  ;;  %655 = vmatpush.msra.mxu2 %v583_v56  ;;  %v497_v52 = vld [vmem:[#allocation8 + $0x58] sm:$0xff]  ;;  %v486_v53 = vld [vmem:[#allocation8] sm:$0xff] }
  0x64   :  { %455 = vmatpush.msra.mxu0 %v442_v14  ;;  %635 = vmatpush.msra.mxu1 %v582_v55  ;;  %v542_v14 = vld [vmem:[#allocation8 + $0x1c0] sm:$0xff]  ;;  %v488_v55 = vld [vmem:[#allocation8 + $0x10] sm:$0xff]  ;;  %v489_v56 = vld [vmem:[#allocation8 + $0x18] sm:$0xff] }
  0x65   :  { %675 = vmatpush.msra.mxu3 %v584_v58  ;;  %656 = vmatpush.msra.mxu2 %v575_v61  ;;  %v611_v58 = vld [vmem:[#allocation8 + $0x3e8] sm:$0xff]  ;;  %v602_v61 = vld [vmem:[#allocation8 + $0x3a0] sm:$0xff] }
  0x66   :  { %456 = vmatpush.msra.mxu0 %v441_v15  ;;  %636 = vmatpush.msra.mxu1 %v574_v60  ;;  %v543_v15 = vld [vmem:[#allocation8 + $0x1c8] sm:$0xff]  ;;  %v613_v60 = vld [vmem:[#allocation8 + $0x3f8] sm:$0xff] }
  0x67   :  { %676 = vmatpush.msra.mxu3 %v576_v63  ;;  %657 = vmatpush.msra.mxu2 %v567_v2  ;;  %v604_v63 = vld [vmem:[#allocation8 + $0x3b0] sm:$0xff]  ;;  %v595_v2 = vld [vmem:[#allocation8 + $0x368] sm:$0xff] }
  0x68   :  { %457 = vmatpush.msra.mxu0 %v440_v16  ;;  %637 = vmatpush.msra.mxu1 %v566_v1  ;;  %v544_v16 = vld [vmem:[#allocation8 + $0x1d0] sm:$0xff]  ;;  %v594_v1 = vld [vmem:[#allocation8 + $0x360] sm:$0xff] }
  0x69   :  { %677 = vmatpush.msra.mxu3 %v568_v4  ;;  %658 = vmatpush.msra.mxu2 %v559_v7  ;;  %v597_v4 = vld [vmem:[#allocation8 + $0x378] sm:$0xff]  ;;  %v588_v7 = vld [vmem:[#allocation8 + $0x330] sm:$0xff] }
  0x6a   :  { %458 = vmatpush.msra.mxu0 %v439_v17  ;;  %638 = vmatpush.msra.mxu1 %v558_v6  ;;  %v545_v17 = vld [vmem:[#allocation8 + $0x1d8] sm:$0xff]  ;;  %v587_v6 = vld [vmem:[#allocation8 + $0x328] sm:$0xff] }
  0x6b   :  { %678 = vmatpush.msra.mxu3 %v560_v8  ;;  %659 = vmatpush.msra.mxu2 %v551_v11  ;;  %v589_v8 = vld [vmem:[#allocation8 + $0x338] sm:$0xff]  ;;  %v580_v11 = vld [vmem:[#allocation8 + $0x2f0] sm:$0xff] }
  0x6c   :  { %459 = vmatpush.msra.mxu0 %v438_v19  ;;  %639 = vmatpush.msra.mxu1 %v550_v10  ;;  %v535_v19 = vld [vmem:[#allocation8 + $0x188] sm:$0xff] }
  0x6d   :  { %679 = vmatpush.msra.mxu3 %v552_v12  ;;  %660 = vmatpush.msra.mxu2 %v543_v15  ;;  %v579_v10 = vld [vmem:[#allocation8 + $0x2e8] sm:$0xff]  ;;  %v581_v12 = vld [vmem:[#allocation8 + $0x2f8] sm:$0xff]  ;;  %v572_v15 = vld [vmem:[#allocation8 + $0x2b0] sm:$0xff] }
  0x6e   :  { %460 = vmatpush.msra.mxu0 %v437_v21  ;;  %640 = vmatpush.msra.mxu1 %v542_v14  ;;  %v536_v21 = vld [vmem:[#allocation8 + $0x190] sm:$0xff]  ;;  %v571_v14 = vld [vmem:[#allocation8 + $0x2a8] sm:$0xff] }
  0x6f   :  { %680 = vmatpush.msra.mxu3 %v544_v16  ;;  %661 = vmatpush.msra.mxu2 %v535_v19  ;;  %v573_v16 = vld [vmem:[#allocation8 + $0x2b8] sm:$0xff]  ;;  %v564_v19 = vld [vmem:[#allocation8 + $0x270] sm:$0xff] }
  0x70   :  { %461 = vmatpush.msra.mxu0 %v436_v23 }
  0x71   :  { %681 = vmatpush.msra.mxu3 %v536_v21  ;;  %v554_v21 = vld [vmem:[#allocation8 + $0x220] sm:$0xff] }
  0x72   :  { %462 = vmatpush.msra.mxu0 %v435_v27  ;;  %v528_v27 = vld [vmem:[#allocation8 + $0x150] sm:$0xff] }
  0x73   :  { %682 = vmatpush.msra.mxu3 %v528_v27  ;;  %v548_v27 = vld [vmem:[#allocation8 + $0x1f0] sm:$0xff] }
  0x74   :  { %463 = vmatpush.msra.mxu0 %v434_v29  ;;  %v518_v29 = vld [vmem:[#allocation8 + $0x100] sm:$0xff] }
  0x76   :  { %464 = vmatpush.msra.mxu0 %v433_v32  ;;  %v521_v32 = vld [vmem:[#allocation8 + $0x118] sm:$0xff] }
  0x78   :  { %465 = vmatpush.msra.mxu0 %v432_v34 }
  0x7a   :  { %466 = vmatpush.msra.mxu0 %v431_v37 }
  0x7c   :  { %692 = vmatpush.msrb.mxu0 %v609_v44  ;;  %v513_v44 = vld [vmem:[#allocation8 + $0xd8] sm:$0xff] }
  0x7e   :  { %693 = vmatpush.msrb.mxu0 %v601_v49  ;;  %v494_v49 = vld [vmem:[#allocation8 + $0x40] sm:$0xff] }
  0x80   :  { %694 = vmatpush.msrb.mxu0 %v593_v54  ;;  %v487_v54 = vld [vmem:[#allocation8 + $0x8] sm:$0xff] }
  0x82   :  { %695 = vmatpush.msrb.mxu0 %v585_v59  ;;  %v612_v59 = vld [vmem:[#allocation8 + $0x3f0] sm:$0xff] }
  0x84   :  { %696 = vmatpush.msrb.mxu0 %v577_v0  ;;  %v605_v0 = vld [vmem:[#allocation8 + $0x3b8] sm:$0xff] }
  0x86   :  { %697 = vmatpush.msrb.mxu0 %v569_v5  ;;  %v586_v5 = vld [vmem:[#allocation8 + $0x320] sm:$0xff] }
  0x88   :  { %698 = vmatpush.msrb.mxu0 %v561_v9  ;;  %v578_v9 = vld [vmem:[#allocation8 + $0x2e0] sm:$0xff] }
  0x8a   :  { %699 = vmatpush.msrb.mxu0 %v553_v13  ;;  %v570_v13 = vld [vmem:[#allocation8 + $0x2a0] sm:$0xff] }
  0x8c   :  { %700 = vmatpush.msrb.mxu0 %v545_v17  ;;  %v562_v17 = vld [vmem:[#allocation8 + $0x260] sm:$0xff] }
  0xce   :  { %v273_v20 = vpop.f32.mrf.mxu0 }
  0xcf   :  { %v274_v22 = vadd.f32 %v848_v18, %v273_v20  ;;  %v534_v18 = vld [vmem:[#allocation8 + $0x180] sm:$0xff] }
  0xd0   :  { %641 = vmatpush.msra.mxu1 %v534_v18  ;;  %v563_v18 = vld [vmem:[#allocation8 + $0x268] sm:$0xff] }
  0xd1   :  { %v293_v24 = vpop.f32.mrf.mxu1 }
  0xd2   :  { %v294_v25 = vadd.f32 %v293_v24, %v274_v22  ;;  %v313_v26 = vpop.f32.mrf.mxu2  ;;  %v537_v22 = vld [vmem:[#allocation8 + $0x198] sm:$0xff]  ;;  %v526_v24 = vld [vmem:[#allocation8 + $0x140] sm:$0xff] }
  0xd3   :  { %701 = vmatpush.msrb.mxu0 %v537_v22  ;;  %642 = vmatpush.msra.mxu1 %v526_v24  ;;  %v555_v22 = vld [vmem:[#allocation8 + $0x228] sm:$0xff]  ;;  %v557_v24 = vld [vmem:[#allocation8 + $0x238] sm:$0xff] }
  0xd4   :  { %v314_v28 = vadd.f32 %v313_v26, %v294_v25  ;;  %v527_v25 = vld [vmem:[#allocation8 + $0x148] sm:$0xff] }
  0xd5   :  { %v333_v30 = vpop.f32.mrf.mxu3  ;;  %662 = vmatpush.msra.mxu2 %v527_v25  ;;  %643 = vmatpush.msra.mxu1 %v518_v29  ;;  %v546_v25 = vld [vmem:[#allocation8 + $0x1e0] sm:$0xff] }
  0xd6   :  { %v334_v31 = vadd.f32 %v333_v30, %v314_v28  ;;  %v529_v28 = vld [vmem:[#allocation8 + $0x158] sm:$0xff]  ;;  %v519_v30 = vld [vmem:[#allocation8 + $0x108] sm:$0xff]  ;;  %v538_v29 = vld [vmem:[#allocation8 + $0x1a0] sm:$0xff] }
  0xd7   :  { %702 = vmatpush.msrb.mxu0 %v529_v28  ;;  %663 = vmatpush.msra.mxu2 %v519_v30  ;;  %v549_v28 = vld [vmem:[#allocation8 + $0x1f8] sm:$0xff]  ;;  %v539_v30 = vld [vmem:[#allocation8 + $0x1a8] sm:$0xff] }
  0xd8   :  { %v353_v33 = vpop.f32.mrf.mxu0  ;;  %644 = vmatpush.msra.mxu1 %v510_v41  ;;  %v525_v41 = vld [vmem:[#allocation8 + $0x138] sm:$0xff] }
  0xd9   :  { %v354_v35 = vadd.f32 %v353_v33, %v334_v31  ;;  %v520_v31 = vld [vmem:[#allocation8 + $0x110] sm:$0xff]  ;;  %703 = vmatpush.msrb.mxu0 %v521_v32  ;;  %664 = vmatpush.msra.mxu2 %v511_v42  ;;  %v541_v32 = vld [vmem:[#allocation8 + $0x1b8] sm:$0xff]  ;;  %v514_v42 = vld [vmem:[#allocation8 + $0xe0] sm:$0xff] }
  0xda   :  { %v373_v36 = vpop.f32.mrf.mxu1  ;;  %683 = vmatpush.msra.mxu3 %v520_v31  ;;  %645 = vmatpush.msra.mxu1 %v502_v45  ;;  %v540_v31 = vld [vmem:[#allocation8 + $0x1b0] sm:$0xff] }
  0xdb   :  { %v374_v38 = vadd.f32 %v373_v36, %v354_v35  ;;  %704 = vmatpush.msrb.mxu0 %v513_v44  ;;  %665 = vmatpush.msra.mxu2 %v503_v46  ;;  %v516_v44 = vld [vmem:[#allocation8 + $0xf0] sm:$0xff]  ;;  %v517_v46 = vld [vmem:[#allocation8 + $0xf8] sm:$0xff] }
  0xdc   :  { %v393_v39 = vpop.f32.mrf.mxu2  ;;  %646 = vmatpush.msra.mxu1 %v494_v49 }
  0xdd   :  { %v394_v43 = vadd.f32 %v393_v39, %v374_v38  ;;  %705 = vmatpush.msrb.mxu0 %v505_v48  ;;  %666 = vmatpush.msra.mxu2 %v495_v50  ;;  %v507_v48 = vld [vmem:[#allocation8 + $0xa8] sm:$0xff]  ;;  %v508_v50 = vld [vmem:[#allocation8 + $0xb0] sm:$0xff] }
  0xde   :  { %v413_v47 = vpop.f32.mrf.mxu3  ;;  %647 = vmatpush.msra.mxu1 %v486_v53  ;;  %v499_v53 = vld [vmem:[#allocation8 + $0x68] sm:$0xff] }
  0xdf   :  { %v1078_v51 = vadd.f32 %v413_v47, %v394_v43  ;;  %v512_v43 = vld [vmem:[#allocation8 + $0xd0] sm:$0xff]  ;;  %706 = vmatpush.msrb.mxu0 %v497_v52  ;;  %667 = vmatpush.msra.mxu2 %v487_v54  ;;  %v498_v52 = vld [vmem:[#allocation8 + $0x60] sm:$0xff] }
  0xe0   :  { %684 = vmatpush.msra.mxu3 %v512_v43  ;;  %v504_v47 = vld [vmem:[#allocation8 + $0x90] sm:$0xff]  ;;  %v515_v43 = vld [vmem:[#allocation8 + $0xe8] sm:$0xff] }
  0xe1   :  { %v417_v57 = vand.u32 2147483647, %v1078_v51  ;;  %v416_v38 = vmax.f32 %v1078_v51, 0.0  ;;  %v496_v51 = vld [vmem:[#allocation8 + $0x50] sm:$0xff]  ;;  %707 = vmatpush.msrb.mxu0 %v489_v56  ;;  %732 = vmatpush.msrb.mxu2 %v611_v58  ;;  %v491_v58 = vld [vmem:[#allocation8 + $0x28] sm:$0xff] }
  0xe2   :  { %685 = vmatpush.msra.mxu3 %v504_v47  ;;  %v506_v47 = vld [vmem:[#allocation8 + $0xa0] sm:$0xff]  ;;  %v500_v54 = vld [vmem:[#allocation8 + $0x70] sm:$0xff] }
  0xe3   :  { %v418_v62 = vsub.f32 0.0, %v417_v57  ;;  %v610_v57 = vld [vmem:[#allocation8 + $0x3e0] sm:$0xff] }
  0xe4   :  { %686 = vmatpush.msra.mxu3 %v496_v51  ;;  %712 = vmatpush.msrb.mxu1 %v610_v57  ;;  %v509_v51 = vld [vmem:[#allocation8 + $0xb8] sm:$0xff]  ;;  %v490_v57 = vld [vmem:[#allocation8 + $0x20] sm:$0xff] }
  0xe5   :  { %v419_v3 = vmul.f32 1.442695, %v418_v62  ;;  %v603_v62 = vld [vmem:[#allocation8 + $0x3a8] sm:$0xff] }
  0xe6   :  { %687 = vmatpush.msra.mxu3 %v488_v55  ;;  %713 = vmatpush.msrb.mxu1 %v602_v61  ;;  %v501_v55 = vld [vmem:[#allocation8 + $0x78] sm:$0xff] }
  0xe7   :  { %850 = vpow2.f32 %v419_v3  ;;  %733 = vmatpush.msrb.mxu2 %v603_v62  ;;  %v596_v3 = vld [vmem:[#allocation8 + $0x370] sm:$0xff] }
  0xe8   :  { %752 = vmatpush.msrb.mxu3 %v612_v59  ;;  %714 = vmatpush.msrb.mxu1 %v594_v1  ;;  %v492_v59 = vld [vmem:[#allocation8 + $0x30] sm:$0xff] }
  0xe9   :  { %734 = vmatpush.msrb.mxu2 %v595_v2 }
  0xea   :  { %753 = vmatpush.msrb.mxu3 %v604_v63  ;;  %715 = vmatpush.msrb.mxu1 %v586_v5 }
  0xeb   :  { %735 = vmatpush.msrb.mxu2 %v587_v6 }
  0xec   :  { %754 = vmatpush.msrb.mxu3 %v596_v3  ;;  %716 = vmatpush.msrb.mxu1 %v578_v9 }
  0xed   :  { %v851_v20 = vpop.eup %850  ;;  %736 = vmatpush.msrb.mxu2 %v579_v10  ;;  %v614_v10 = vld [vmem:[#allocation10] sm:$0xff] }
  0xee   :  { %v421_v23 = vadd.f32 1.0, %v851_v20  ;;  %v424_v26 = vmul.f32 -0.5, %v851_v20  ;;  %v427_v34 = vand.u32 2147483647, %v851_v20  ;;  %755 = vmatpush.msrb.mxu3 %v588_v7  ;;  %717 = vmatpush.msrb.mxu1 %v570_v13  ;;  %v617_v13 = vperm.slane %v614_v10, 1 }
  0xef   :  { %737 = vmatpush.msrb.mxu2 %v571_v14 }
  0xf0   :  { %852 = vlog2.f32 %v421_v23  ;;  %v425_v33 = vadd.f32 1.0, %v424_v26  ;;  %vm428_vm0 = vcmp.lt.f32.partialorder %v427_v34, 0.0004427343  ;;  %756 = vmatpush.msrb.mxu3 %v580_v11  ;;  %718 = vmatpush.msrb.mxu1 %v562_v17  ;;  %v556_v23 = vld [vmem:[#allocation8 + $0x230] sm:$0xff]  ;;  %v547_v26 = vld [vmem:[#allocation8 + $0x1e8] sm:$0xff] }
  0xf1   :  { %738 = vmatpush.msrb.mxu2 %v563_v18  ;;  %v531_v34 = vld [vmem:[#allocation8 + $0x168] sm:$0xff] }
  0xf2   :  { %v426_v37 = vmul.f32 %v851_v20, %v425_v33  ;;  %757 = vmatpush.msrb.mxu3 %v572_v15  ;;  %v565_v20 = vld [vmem:[#allocation8 + $0x278] sm:$0xff]  ;;  %719 = vmatpush.msrb.mxu1 %v554_v21  ;;  %v530_v33 = vld [vmem:[#allocation8 + $0x160] sm:$0xff]  ;;  %v618_v15 = vperm.slane %v614_v10, 2 }
  0xf3   :  { %739 = vmatpush.msrb.mxu2 %v555_v22 }
  0xf4   :  { %758 = vmatpush.msrb.mxu3 %v564_v19  ;;  %720 = vmatpush.msrb.mxu1 %v546_v25 }
  0xf5   :  { %740 = vmatpush.msrb.mxu2 %v547_v26  ;;  %v623_v26 = vperm.slane %v614_v10, 7 }
  0xf6   :  { %v853_v35 = vpop.eup %852  ;;  %759 = vmatpush.msrb.mxu3 %v556_v23  ;;  %721 = vmatpush.msrb.mxu1 %v538_v29  ;;  %v621_v29 = vperm.slane %v614_v10, 5 }
  0xf7   :  { %v423_v36 = vmul.f32 0.6931472, %v853_v35  ;;  %741 = vmatpush.msrb.mxu2 %v539_v30  ;;  %v532_v35 = vld [vmem:[#allocation8 + $0x170] sm:$0xff] }
  0xf8   :  { %760 = vmatpush.msrb.mxu3 %v548_v27  ;;  %722 = vmatpush.msrb.mxu1 %v530_v33 }
  0xf9   :  { %v429_v39 = vsel %vm428_vm0, %v426_v37, %v423_v36  ;;  %v533_v36 = vld [vmem:[#allocation8 + $0x178] sm:$0xff]  ;;  %742 = vmatpush.msrb.mxu2 %v531_v34  ;;  %v522_v37 = vld [vmem:[#allocation8 + $0x120] sm:$0xff] }
  0xfa   :  { %v430_v40 = vadd.f32 %v429_v39, %v416_v38  ;;  %761 = vmatpush.msrb.mxu3 %v540_v31  ;;  %v523_v38 = vld [vmem:[#allocation8 + $0x128] sm:$0xff]  ;;  %v524_v39 = vld [vmem:[#allocation8 + $0x130] sm:$0xff]  ;;  %723 = vmatpush.msrb.mxu1 %v522_v37  ;;  %v622_v31 = vperm.slane %v614_v10, 6 }
  0xfb   :  { %743 = vmatpush.msrb.mxu2 %v523_v38 }
  0xfc   :  { %467 = vmatmul.f32.vlgmr.msra.gmra.mxu0 %v430_v40  ;;  %v849_v40 = vld [vmem:[%s1098_s4] ss:$0 sm:$0xff]  ;;  %762 = vmatpush.msrb.mxu3 %v532_v35  ;;  %s1019_s4 = smov [#allocation11]  }
  0xfd   :  { %772 = vmatpush.msra.mxu0 %v613_v60  ;;  %724 = vmatpush.msrb.mxu1 %v514_v42  ;;  %v493_v60 = vld [vmem:[#allocation8 + $0x38] sm:$0xff]  ;;  %s824_s28 = sshll.u32 %s1019_s4, 4  ;;  %s825_s28 = int_to_ptr.vmem [resolvable:$true] %s824_s28 }
  0xfe   :  { %763 = vmatpush.msrb.mxu3 %v524_v39  ;;  %744 = vmatpush.msrb.mxu2 %v515_v43 }
  0xff   :  { %773 = vmatpush.msra.mxu0 %v605_v0  ;;  %725 = vmatpush.msrb.mxu1 %v506_v47 }
 0x100   :  { %764 = vmatpush.msrb.mxu3 %v516_v44  ;;  %745 = vmatpush.msrb.mxu2 %v507_v48 }
 0x101   :  { %774 = vmatpush.msra.mxu0 %v597_v4  ;;  %726 = vmatpush.msrb.mxu1 %v498_v52 }
 0x102   :  { %765 = vmatpush.msrb.mxu3 %v508_v50  ;;  %746 = vmatpush.msrb.mxu2 %v499_v53 }
 0x103   :  { %775 = vmatpush.msra.mxu0 %v589_v8  ;;  %727 = vmatpush.msrb.mxu1 %v490_v57 }
 0x104   :  { %766 = vmatpush.msrb.mxu3 %v500_v54  ;;  %747 = vmatpush.msrb.mxu2 %v491_v58 }
 0x105   :  { %776 = vmatpush.msra.mxu0 %v581_v12  ;;  %v619_v12 = vperm.slane %v614_v10, 3 }
 0x106   :  { %767 = vmatpush.msrb.mxu3 %v492_v59 }
 0x107   :  { %777 = vmatpush.msra.mxu0 %v573_v16  ;;  %v616_v16 = vperm.slane %v614_v10, 0 }
 0x109   :  { %778 = vmatpush.msra.mxu0 %v565_v20 }
 0x10b   :  { %779 = vmatpush.msra.mxu0 %v557_v24 }
 0x10d   :  { %780 = vmatpush.msra.mxu0 %v549_v28 }
 0x10f   :  { %781 = vmatpush.msra.mxu0 %v541_v32  ;;  %v620_v32 = vperm.slane %v614_v10, 4 }
 0x111   :  { %782 = vmatpush.msra.mxu0 %v533_v36 }
 0x113   :  { %783 = vmatpush.msra.mxu0 %v525_v41 }
 0x115   :  { %784 = vmatpush.msra.mxu0 %v517_v46 }
 0x117   :  { %785 = vmatpush.msra.mxu0 %v509_v51 }
 0x119   :  { %786 = vmatpush.msra.mxu0 %v501_v55 }
 0x11b   :  { %787 = vmatpush.msra.mxu0 %v493_v60 }
 0x179   :  { %v468_v45 = vpop.f32.mrf.mxu0 }
 0x17a   :  { %v469_v49 = vadd.f32 %v849_v40, %v468_v45 }
 0x17c   :  { %v472_v56 = vand.u32 2147483647, %v469_v49  ;;  %v471_v7 = vmax.f32 %v469_v49, 0.0 }
 0x17e   :  { %v473_v61 = vsub.f32 0.0, %v472_v56 }
 0x180   :  { %v474_v62 = vmul.f32 1.442695, %v473_v61 }
 0x182   :  { %854 = vpow2.f32 %v474_v62 }
 0x188   :  { %v855_v63 = vpop.eup %854 }
 0x189   :  { %v476_v0 = vadd.f32 1.0, %v855_v63  ;;  %v479_v1 = vmul.f32 -0.5, %v855_v63  ;;  %v482_v3 = vand.u32 2147483647, %v855_v63 }
 0x18b   :  { %856 = vlog2.f32 %v476_v0  ;;  %v480_v2 = vadd.f32 1.0, %v479_v1  ;;  %vm483_vm1 = vcmp.lt.f32.partialorder %v482_v3, 0.0004427343 }
 0x18d   :  { %v481_v6 = vmul.f32 %v855_v63, %v480_v2 }
 0x191   :  { %v857_v4 = vpop.eup %856 }
 0x192   :  { %v478_v5 = vmul.f32 0.6931472, %v857_v4 }
 0x194   :  { %v484_v8 = vsel %vm483_vm1, %v481_v6, %v478_v5 }
 0x195   :  { %v485_v9 = vadd.f32 %v484_v8, %v471_v7 }
 0x197   :  { %648 = vmatmul.f32.vlgmr.msra.gmra.mxu1 %v485_v9  ;;  %668 = vmatmul.f32.vlgmr.msra.gmra.mxu2 %v485_v9 }
 0x198   :  { %688 = vmatmul.f32.vlgmr.msra.gmra.mxu3 %v485_v9  ;;  %708 = vmatmul.f32.vlgmr.msrb.gmra.mxu0 %v485_v9 }
 0x19f   :  { %728 = vmatmul.f32.vlgmr.msrb.gmra.mxu1 %v485_v9  ;;  %748 = vmatmul.f32.vlgmr.msrb.gmra.mxu2 %v485_v9 }
 0x1a0   :  { %768 = vmatmul.f32.vlgmr.msrb.gmra.mxu3 %v485_v9  ;;  %788 = vmatmul.f32.vlgmr.msra.gmra.mxu0 %v485_v9 }
 0x214   :  { %v649_v14 = vpop.f32.mrf.mxu1 }
 0x215   :  { %v709_v11 = vpop.f32.mrf.mxu0  ;;  %v650_v22 = vadd.f32 %v649_v14, %v616_v16 }
 0x216   :  { %v710_v17 = vadd.f32 %v709_v11, %v619_v12 }
 0x218   :  { %v802_v24 = vrot.slane %v710_v17, 2 }
 0x21a   :  { %v669_v18 = vpop.f32.mrf.mxu2 }
 0x21b   :  { %v670_v19 = vadd.f32 %v669_v18, %v617_v13  ;;  %v689_v20 = vpop.f32.mrf.mxu3 }
 0x21c   :  { %v690_v21 = vadd.f32 %v689_v20, %v618_v15  ;;  %v729_v34 = vpop.f32.mrf.mxu1 }
 0x21d   :  { %v800_v23 = vrot.slane %v670_v19, 6  ;;  %v789_v28 = vpop.f32.mrf.mxu0  ;;  %v730_v40 = vadd.f32 %v729_v34, %v620_v32 }
 0x21e   :  { %v801_v25 = vrot.slane %v690_v21, 4  ;;  %v790_v35 = vadd.f32 %v789_v28, %v623_v26 }
 0x21f   :  { %v807_v27 = vsel %vm806_vm2, %v650_v22, %v800_v23 }
 0x220   :  { %v809_v30 = vsel %vm808_vm3, %v801_v25, %v802_v24  ;;  %v805_v42 = vrot.slane %v790_v35, 2 }
 0x221   :  { %v811_v33 = vsel %vm810_vm4, %v807_v27, %v809_v30 }
 0x222   :  { %v749_v36 = vpop.f32.mrf.mxu2  ;;  %817 = vst [vmem:[#allocation11] sm:$0xff] %v811_v33 }
 0x223   :  { %v750_v37 = vadd.f32 %v749_v36, %v621_v29  ;;  %v769_v38 = vpop.f32.mrf.mxu3 }
 0x224   :  { %v770_v39 = vadd.f32 %v769_v38, %v622_v31 }
 0x225   :  { %v803_v41 = vrot.slane %v750_v37, 6 }
 0x226   :  { %v804_v43 = vrot.slane %v770_v39, 4 }
 0x227   :  { %v812_v44 = vsel %vm806_vm2, %v730_v40, %v803_v41 }
 0x228   :  { %v813_v45 = vsel %vm808_vm3, %v804_v43, %v805_v42 }
 0x229   :  { %v814_v46 = vsel %vm810_vm4, %v812_v44, %v813_v45 }
 0x22a   :  { %818 = vst [vmem:[#allocation11 + $0x8] sm:$0xff] %v814_v46 }
 0x22b   :  { %829 = dma.vmem_to_hbm [thread:$0]  %s825_s28, 256, %s827_s8, [#allocation4]  }
 0x22c   :  { %1008 = dma.done.wait [#allocation4], 256  }
 0x22d   :  { %1009 = vsyncadd [#allocation4], 4294967040 }
 0x22e   :  { %834 = vsyncpa [#allocation3], 1 }
 0x22f   :  { %835 = vsyncpa [#allocation6], 1 }
 0x230   :  { %836 = vsyncpa [#allocation9], 1 }
 0x231   :  { %837 = vsyncpa [#allocation4], 1 }

</bundles_post_ra>
